<compile_context>
chip_gen: v5e
topology: v5e:2x2
jax: 0.10.0
libtpu: 0.0.40
codegen_flags: <defaults>
</compile_context>

<pallas_src>
import math

import jax
import jax.numpy as jnp
from jax.experimental import pallas as pl
from jax.experimental.pallas import tpu as pltpu


N_OBSERVATIONS = 8   # LunarLander-v3 state dimension
N_ACTIONS = 4        # LunarLander-v3 discrete action count
HIDDEN = 64
LANE = 128           # TPU lane width; batch tiles are lane-aligned

TILE_B_DEFAULT = 2048     # rows of the batch per grid step (multiple of 128)
MIN_PALLAS_BATCH = 1024   # below this, plain XLA beats a custom call


def dqn_kernel(x_ref, w1_ref, b1_ref, w2_ref, b2_ref, w3_ref, b3_ref, out_ref):
    """One batch tile, feature-major: (n_obs, tile_b) -> (n_actions, tile_b)."""
    # f32 x streamed from HBM; bf16 cast on the VPU (hidden under DMA pipeline).
    x = x_ref[...].astype(jnp.bfloat16)                       # (8, tile_b)

    # Layer 1: bf16 MXU matmul, f32 accumulate, f32 bias + ReLU.
    h1 = jnp.dot(w1_ref[...], x,
                 preferred_element_type=jnp.float32) + b1_ref[...]
    h1 = jnp.maximum(h1, 0.0)                                 # (64, tile_b) f32

    # Layer 2
    h2 = jnp.dot(w2_ref[...], h1.astype(jnp.bfloat16),
                 preferred_element_type=jnp.float32) + b2_ref[...]
    h2 = jnp.maximum(h2, 0.0)                                 # (64, tile_b) f32

    # Layer 3: Q-values (no activation), lane-dense store.
    q = jnp.dot(w3_ref[...], h2.astype(jnp.bfloat16),
                preferred_element_type=jnp.float32) + b3_ref[...]
    out_ref[...] = q.astype(out_ref.dtype)                    # (4, tile_b)


def _pick_tile_b(batch):
    """Lane-aligned tile, capped at TILE_B_DEFAULT, >=2 grid steps when possible
    so both v7x TensorCores get work (no effect on v5e/v6e)."""
    half = -(-batch // 2)
    tile = ((half + LANE - 1) // LANE) * LANE
    return max(LANE, min(TILE_B_DEFAULT, tile))


def prepare_params(params):
    """One-time prep of PyTorch-layout f32 params for the kernel:
    weights (out, in) -> bf16 (kept as-is: the feature-major kernel wants
    exactly the PyTorch layout), biases (out,) -> f32 column vectors (out, 1)."""
    w1, b1, w2, b2, w3, b3 = params
    return (w1.astype(jnp.bfloat16), b1.reshape(-1, 1),
            w2.astype(jnp.bfloat16), b2.reshape(-1, 1),
            w3.astype(jnp.bfloat16), b3.reshape(-1, 1))


def dqn_forward(x, kernel_params, *, tile_b=None):
    """Pallas path. x: (batch, n_obs) f32; kernel_params: prepare_params(...)."""
    w1, b1, w2, b2, w3, b3 = kernel_params
    batch = x.shape[0]
    if tile_b is None:
        tile_b = _pick_tile_b(batch)
    n_tiles = pl.cdiv(batch, tile_b)

    # The only wrapper pass over x: feature-major view for lane-dense tiles.
    # (Callers that already hold x as (n_obs, batch) can skip this transpose.)
    x_t = x.T                                                  # (8, batch) f32

    flops = 2 * batch * (N_OBSERVATIONS * HIDDEN
                         + HIDDEN * HIDDEN
                         + HIDDEN * N_ACTIONS)
    bytes_accessed = (x.size * 4                               # f32 input stream
                      + batch * N_ACTIONS * 4                  # f32 output stream
                      + (w1.size + w2.size + w3.size) * 2      # bf16 weights
                      + (b1.size + b2.size + b3.size) * 4)     # f32 biases

    q_t = pl.pallas_call(
        dqn_kernel,
        out_shape=jax.ShapeDtypeStruct((N_ACTIONS, batch), jnp.float32),
        grid_spec=pltpu.PrefetchScalarGridSpec(
            num_scalar_prefetch=0,
            grid=(n_tiles,),
            in_specs=[
                # x^T: one lane-dense batch tile per step (double-buffered DMA;
                # the partial last tile is masked by Pallas — no wrapper pad).
                pl.BlockSpec((N_OBSERVATIONS, tile_b), lambda i: (0, i)),
                # Weights / biases: same block every step -> VMEM-resident.
                pl.BlockSpec((HIDDEN, N_OBSERVATIONS), lambda i: (0, 0)),
                pl.BlockSpec((HIDDEN, 1), lambda i: (0, 0)),
                pl.BlockSpec((HIDDEN, HIDDEN), lambda i: (0, 0)),
                pl.BlockSpec((HIDDEN, 1), lambda i: (0, 0)),
                pl.BlockSpec((N_ACTIONS, HIDDEN), lambda i: (0, 0)),
                pl.BlockSpec((N_ACTIONS, 1), lambda i: (0, 0)),
            ],
            out_specs=pl.BlockSpec((N_ACTIONS, tile_b), lambda i: (0, i)),
        ),
        compiler_params=pltpu.CompilerParams(
            dimension_semantics=("parallel",),          # megacore split on v7x
            vmem_limit_bytes=32 * 1024 * 1024,          # ample on v5e/v6e/v7x
        ),
        cost_estimate=pl.CostEstimate(
            flops=flops, transcendentals=0, bytes_accessed=bytes_accessed),
    )(x_t, w1, b1, w2, b2, w3, b3)

    return q_t.T                                               # (batch, 4)


def dqn_forward_auto(x, params, kernel_params, *, tile_b=None):
    """Dispatch: small batches (single-state inference / typical DQN training
    batches) go to plain XLA; large rollout batches use the Pallas kernel."""
    if x.shape[0] < MIN_PALLAS_BATCH:
        return reference_forward(x, params)
    return dqn_forward(x, kernel_params, tile_b=tile_b)


def init_linear(key, fan_in, fan_out):
    """Mimics torch.nn.Linear init (uniform +/- 1/sqrt(fan_in)), PyTorch layout:
    W is (out, in), b is (out,)."""
    k_w, k_b = jax.random.split(key)
    bound = 1.0 / math.sqrt(fan_in)
    w = jax.random.uniform(k_w, (fan_out, fan_in), jnp.float32, -bound, bound)
    b = jax.random.uniform(k_b, (fan_out,), jnp.float32, -bound, bound)
    return w, b


def init_params(key):
    k1, k2, k3 = jax.random.split(key, 3)
    w1, b1 = init_linear(k1, N_OBSERVATIONS, HIDDEN)
    w2, b2 = init_linear(k2, HIDDEN, HIDDEN)
    w3, b3 = init_linear(k3, HIDDEN, N_ACTIONS)
    return w1, b1, w2, b2, w3, b3


def reference_forward(x, params):
    """Plain-JAX f32 reference (PyTorch semantics: y = x @ W.T + b)."""
    w1, b1, w2, b2, w3, b3 = params
    h1 = jnp.maximum(x @ w1.T + b1, 0.0)
    h2 = jnp.maximum(h1 @ w2.T + b2, 0.0)
    return h2 @ w3.T + b3


if __name__ == "__main__":
    key = jax.random.PRNGKey(0)
    k_params, k_x = jax.random.split(key)

    params = init_params(k_params)          # f32, PyTorch layout
    kparams = prepare_params(params)        # bf16 weights, column biases (once)

    # Small batch that is NOT a multiple of the tile: exercises a multi-step
    # grid, VMEM-resident weights, and the masked partial last tile (no pad).
    batch, tile_b = 300, 128
    x = jax.random.normal(k_x, (batch, N_OBSERVATIONS), jnp.float32)

    q_kernel = dqn_forward(x, kparams, tile_b=tile_b)
    jax.block_until_ready(q_kernel)

    q_ref = reference_forward(x, params)
    assert q_kernel.shape == (batch, N_ACTIONS)
    # bf16 matmul inputs -> loosened tolerance vs the f32 reference.
    assert jnp.allclose(q_kernel, q_ref, atol=5e-2, rtol=5e-2), (
        "max abs err", float(jnp.max(jnp.abs(q_kernel - q_ref))))

    # Adaptive tile selection path (>=2 grid steps for v7x megacore).
    q_auto_tile = dqn_forward(x, kparams)
    jax.block_until_ready(q_auto_tile)
    assert jnp.allclose(q_auto_tile, q_ref, atol=5e-2, rtol=5e-2)

    # Single-state inference dispatches to plain JAX (no kernel overhead).
    x_small = x[:4]
    q_small = dqn_forward_auto(x_small, params, kparams)
    assert jnp.allclose(q_small, reference_forward(x_small, params),
                        atol=1e-5, rtol=1e-5)

    print("KERNEL_OK")
</pallas_src>

<mosaic_0001>
module attributes {stable_mosaic.version = 11 : i64} {
  func.func @dqn_kernel(%arg0: i32, %arg1: memref<8x128xf32, #tpu.memory_space<vmem>>, %arg2: memref<64x8xbf16, #tpu.memory_space<vmem>>, %arg3: memref<64x1xf32, #tpu.memory_space<vmem>>, %arg4: memref<64x64xbf16, #tpu.memory_space<vmem>>, %arg5: memref<64x1xf32, #tpu.memory_space<vmem>>, %arg6: memref<4x64xbf16, #tpu.memory_space<vmem>>, %arg7: memref<4x1xf32, #tpu.memory_space<vmem>>, %arg8: memref<4x128xf32, #tpu.memory_space<vmem>>) attributes {dimension_semantics = [#tpu.dimension_semantics<parallel>], iteration_bounds = array<i64: 3>, scalar_prefetch = 0 : i64, scratch_operands = 0 : i64, tpu.core_type = #tpu.core_type<tc>, window_params = [{transform_indices = @transform_0, window_bounds = array<i64: 8, 128>}, {pipeline_mode = #tpu.pipeline_mode<synchronous>, transform_indices = @transform_1, window_bounds = array<i64: 64, 8>}, {pipeline_mode = #tpu.pipeline_mode<synchronous>, transform_indices = @transform_2, window_bounds = array<i64: 64, 1>}, {pipeline_mode = #tpu.pipeline_mode<synchronous>, transform_indices = @transform_3, window_bounds = array<i64: 64, 64>}, {pipeline_mode = #tpu.pipeline_mode<synchronous>, transform_indices = @transform_4, window_bounds = array<i64: 64, 1>}, {pipeline_mode = #tpu.pipeline_mode<synchronous>, transform_indices = @transform_5, window_bounds = array<i64: 4, 64>}, {pipeline_mode = #tpu.pipeline_mode<synchronous>, transform_indices = @transform_6, window_bounds = array<i64: 4, 1>}, {transform_indices = @transform_7, window_bounds = array<i64: 4, 128>}]} {
    %c0 = arith.constant 0 : index
    %c0_0 = arith.constant 0 : index
    %0 = vector.load %arg1[%c0, %c0_0] : memref<8x128xf32, #tpu.memory_space<vmem>>, vector<8x128xf32>
    %1 = arith.truncf %0 : vector<8x128xf32> to vector<8x128xbf16>
    %c0_1 = arith.constant 0 : index
    %c0_2 = arith.constant 0 : index
    %2 = vector.load %arg2[%c0_1, %c0_2] : memref<64x8xbf16, #tpu.memory_space<vmem>>, vector<64x8xbf16>
    %cst = arith.constant dense<0.000000e+00> : vector<64x128xf32>
    %3 = tpu.matmul %2, %1, %cst {dimension_numbers = #tpu.dot_dimension_numbers<[1], [0], [0], [1], [0, 0, 1, 1], [], []>} : vector<64x8xbf16>, vector<8x128xbf16>, vector<64x128xf32> -> vector<64x128xf32>
    %c0_3 = arith.constant 0 : index
    %c0_4 = arith.constant 0 : index
    %4 = vector.load %arg3[%c0_3, %c0_4] : memref<64x1xf32, #tpu.memory_space<vmem>>, vector<64x1xf32>
    %5 = vector.broadcast %4 : vector<64x1xf32> to vector<64x128xf32>
    %6 = arith.addf %3, %5 : vector<64x128xf32>
    %cst_5 = arith.constant 0.000000e+00 : f32
    %7 = vector.broadcast %cst_5 : f32 to vector<64x128xf32>
    %8 = arith.maximumf %6, %7 : vector<64x128xf32>
    %c0_6 = arith.constant 0 : index
    %c0_7 = arith.constant 0 : index
    %9 = vector.load %arg4[%c0_6, %c0_7] : memref<64x64xbf16, #tpu.memory_space<vmem>>, vector<64x64xbf16>
    %10 = arith.truncf %8 : vector<64x128xf32> to vector<64x128xbf16>
    %cst_8 = arith.constant dense<0.000000e+00> : vector<64x128xf32>
    %11 = tpu.matmul %9, %10, %cst_8 {dimension_numbers = #tpu.dot_dimension_numbers<[1], [0], [0], [1], [0, 0, 1, 1], [], []>} : vector<64x64xbf16>, vector<64x128xbf16>, vector<64x128xf32> -> vector<64x128xf32>
    %c0_9 = arith.constant 0 : index
    %c0_10 = arith.constant 0 : index
    %12 = vector.load %arg5[%c0_9, %c0_10] : memref<64x1xf32, #tpu.memory_space<vmem>>, vector<64x1xf32>
    %13 = vector.broadcast %12 : vector<64x1xf32> to vector<64x128xf32>
    %14 = arith.addf %11, %13 : vector<64x128xf32>
    %cst_11 = arith.constant 0.000000e+00 : f32
    %15 = vector.broadcast %cst_11 : f32 to vector<64x128xf32>
    %16 = arith.maximumf %14, %15 : vector<64x128xf32>
    %c0_12 = arith.constant 0 : index
    %c0_13 = arith.constant 0 : index
    %17 = vector.load %arg6[%c0_12, %c0_13] : memref<4x64xbf16, #tpu.memory_space<vmem>>, vector<4x64xbf16>
    %18 = arith.truncf %16 : vector<64x128xf32> to vector<64x128xbf16>
    %cst_14 = arith.constant dense<0.000000e+00> : vector<4x128xf32>
    %19 = tpu.matmul %17, %18, %cst_14 {dimension_numbers = #tpu.dot_dimension_numbers<[1], [0], [0], [1], [0, 0, 1, 1], [], []>} : vector<4x64xbf16>, vector<64x128xbf16>, vector<4x128xf32> -> vector<4x128xf32>
    %c0_15 = arith.constant 0 : index
    %c0_16 = arith.constant 0 : index
    %20 = vector.load %arg7[%c0_15, %c0_16] : memref<4x1xf32, #tpu.memory_space<vmem>>, vector<4x1xf32>
    %21 = vector.broadcast %20 : vector<4x1xf32> to vector<4x128xf32>
    %22 = arith.addf %19, %21 : vector<4x128xf32>
    %c0_17 = arith.constant 0 : index
    %c0_18 = arith.constant 0 : index
    %23 = vector.load %arg8[%c0_17, %c0_18] : memref<4x128xf32, #tpu.memory_space<vmem>>, vector<4x128xf32>
    tpu.vector_store %arg8[%c0_17, %c0_18], %22 {strides = array<i32>} : memref<4x128xf32, #tpu.memory_space<vmem>>, vector<4x128xf32>,
    return
  }
  func.func @transform_0(%arg0: i32) -> (i32, i32) {
    %c0_i32 = arith.constant 0 : i32
    %c0_i32_0 = arith.constant 0 : i32
    return %c0_i32, %arg0 : i32, i32
  }
  func.func @transform_1(%arg0: i32) -> (i32, i32) {
    %c0_i32 = arith.constant 0 : i32
    %c0_i32_0 = arith.constant 0 : i32
    %c0_i32_1 = arith.constant 0 : i32
    return %c0_i32, %c0_i32_0 : i32, i32
  }
  func.func @transform_2(%arg0: i32) -> (i32, i32) {
    %c0_i32 = arith.constant 0 : i32
    %c0_i32_0 = arith.constant 0 : i32
    %c0_i32_1 = arith.constant 0 : i32
    return %c0_i32, %c0_i32_0 : i32, i32
  }
  func.func @transform_3(%arg0: i32) -> (i32, i32) {
    %c0_i32 = arith.constant 0 : i32
    %c0_i32_0 = arith.constant 0 : i32
    %c0_i32_1 = arith.constant 0 : i32
    return %c0_i32, %c0_i32_0 : i32, i32
  }
  func.func @transform_4(%arg0: i32) -> (i32, i32) {
    %c0_i32 = arith.constant 0 : i32
    %c0_i32_0 = arith.constant 0 : i32
    %c0_i32_1 = arith.constant 0 : i32
    return %c0_i32, %c0_i32_0 : i32, i32
  }
  func.func @transform_5(%arg0: i32) -> (i32, i32) {
    %c0_i32 = arith.constant 0 : i32
    %c0_i32_0 = arith.constant 0 : i32
    %c0_i32_1 = arith.constant 0 : i32
    return %c0_i32, %c0_i32_0 : i32, i32
  }
  func.func @transform_6(%arg0: i32) -> (i32, i32) {
    %c0_i32 = arith.constant 0 : i32
    %c0_i32_0 = arith.constant 0 : i32
    %c0_i32_1 = arith.constant 0 : i32
    return %c0_i32, %c0_i32_0 : i32, i32
  }
  func.func @transform_7(%arg0: i32) -> (i32, i32) {
    %c0_i32 = arith.constant 0 : i32
    %c0_i32_0 = arith.constant 0 : i32
    return %c0_i32, %arg0 : i32, i32
  }
}

</mosaic_0001>

<bundles_post_ra>
// kernel: tpu_custom_call.1
= control target key start
LH: loop header
LB: loop body
LE: loop exit
PB: predicated region body
PF: predicated region fallthrough
CT: control target
= control target key end

     0   :  { %12 = vsyncpa [#allocation3], 0  ;;  %s1028_s0 = inlined_call_operand.vmem [shape: f32[8,300], index: 0, kind: input, shape index: {}]   ;;  %s1029_s1 = inlined_call_operand.vmem [shape: bf16[64,8], index: 1, kind: input, shape index: {}]   ;;  %s1030_s2 = inlined_call_operand.vmem [shape: f32[64,1], index: 2, kind: input, shape index: {}]   ;;  %s1031_s3 = inlined_call_operand.vmem [shape: bf16[64,64], index: 3, kind: input, shape index: {}]   ;;  %s1032_s4 = inlined_call_operand.vmem [shape: f32[64,1], index: 4, kind: input, shape index: {}]   ;;  %s1033_s5 = inlined_call_operand.vmem [shape: bf16[4,64], index: 5, kind: input, shape index: {}]   ;;  %s1034_s6 = inlined_call_operand.vmem [shape: f32[4,1], index: 6, kind: input, shape index: {}]   ;;  %s1035_s7 = inlined_call_operand.hbm [shape: f32[4,300], index: 7, kind: output, shape index: {}]  }
   0x1   :  { %14 = vsyncpa [#allocation3 + $0x1], 0  ;;  %s856_s24 = smov 0   ;;  %s858_s25 = smov 0  }
   0x2   :  { %s860_s26 = smov 0   ;;  %s862_s27 = smov 0  }
   0x3 LB: > { %s877_s28 = sadd.s32 4294967295, %s813_s27   ;;  %s640_s29 = sadd.s32 4294967294, %s813_s27   ;;  %s813_s27 = sphi %s862_s27, %s1041_s27   ;;  %s809_s26 = sphi %s860_s26, %s1040_s26   ;;  %s805_s25 = sphi %s858_s25, %s1039_s25   ;;  %s801_s24 = sphi %s856_s24, %s1038_s24  }
   0x4   : > { %s881_s30 = sadd.s32 1, %s813_s27   ;;  %s179_s8 = sadd.s32 1, %s809_s26 }
   0x5   : > { %s176_s9 = ssub.s32 %s813_s27, %s881_s30  ;;  %p189_p0 = scmp.ne.s32.totalorder %s809_s26, %s805_s25 }
   0x6   : > { %p177_p1 = scmp.eq.s32.totalorder %s176_s9, 0  ;;  %p190_p2 = scmp.eq.s32.totalorder %s877_s28, 2 }
   0x7   : > { %p195_p3 = scmp.ne.s32.totalorder %s805_s25, %s801_s24  ;;  %p196_p4 = scmp.eq.s32.totalorder %s640_s29, 2 }
   0x8   : > { %s892_s10 = scalar_select %p177_p1, %s809_s26, %s179_s8  }
   0x9   : > { %p894_p5 = por %p190_p2, %p189_p0  ;;  %p898_p6 = por %p196_p4, %p195_p3 }
   0xa   : > { %p643_p7 = scmp.ge.s32.totalorder %s813_s27, 1  ;;  %p239_p8 = scmp.lt.s32.totalorder %s813_s27, 4 }
   0xc   : > { %p240_p9 = pnand %p643_p7, %p239_p8 }
   0xd   : > { %p270_p10 = scmp.lt.s32.totalorder (!%p240_p9), %s877_s28, 2  ;;  %s267_s14 = sand.u32 (!%p240_p9), 1, %s805_s25  }
   0xe   : > { %243 = sbr.rel (%p240_p9) target bundleno = 531 (0x213), region = 48  ;;  %s688_s15 = sshll.u32 (!%p240_p9), %s877_s28, 2 }
   0xf   : > { %s644_s16 = sshll.u32 (!%p240_p9), %s267_s14, 2  ;;  %s576_s19 = scalar_lea.hbm (!%p240_p9), %s1035_s7, %s688_s15 }
  0x10   : > { %s269_s20 = scalar_lea.vmem (!%p240_p9), [#allocation2], %s644_s16  ;;  %s580_s22 = sshll.u32 (!%p240_p9), %s576_s19, 4  ;;  %s581_s22 = int_to_ptr.hbm [resolvable:$true] %s580_s22 }
  0x11   : > { %s566_s23 = scalar_lea.sflag (!%p240_p9), [#allocation3], %s267_s14  ;;  %s765_s29 = sshra.s32 (!%p240_p9), %s581_s22, 4  ;;  %s766_s29 = int_to_ptr.hbm [resolvable:$true] %s765_s29 }
  0x12   : > { %s767_s8 = scalar_lea.hbm (!%p240_p9), %s766_s29, 4  ;;  %s771_s13 = scalar_lea.hbm (!%p240_p9), %s1035_s7, 12 }
  0x13   : > { %v291_v0 = vld [vmem:[%s1030_s2 + $0x30] sm:$0xff]  ;;  %v815_v1 = vmov 0   ;;  %v289_v2 = vld [vmem:[%s1030_s2 + $0x20] sm:$0xff]  ;;  %s271_s17 = scalar_select %p270_p10, %s877_s28, 2  ;;  %vm366_vm0 = vcmask 1043456   ;;  %v292_v5 = vld [vmem:[%s1030_s2 + $0x38] sm:$0xff] }
  0x14   : > { %748 = vset.pattern.permute.xlu0 %v815_v1  ;;  %749 = vset.pattern.permute.xlu1 %v815_v1  ;;  %v290_v6 = vld [vmem:[%s1030_s2 + $0x28] sm:$0xff]  ;;  %v691_v8 = vld [vmem:[%s1029_s1] sm:$0xff]  ;;  %vm353_vm1 = vcmask 64512   ;;  %v694_v9 = vld [vmem:[%s1029_s1 + $0x18] sm:$0xff]  ;;  %vm487_vm2 = vcmask 523264   ;;  %p768_p11 = scmp.ne.s32.totalorder %s766_s29, %s767_s8  ;;  %p772_p0 = scmp.lt.s32.totalorder %s766_s29, %s1035_s7 }
  0x15   : > { %325 = vperm.xlu0 %748, %v291_v0   ;;  %315 = vperm.xlu1 %749, %v289_v2   ;;  %s645_s18 = sshll.u32 %s271_s17, 3  ;;  %v287_v10 = vld [vmem:[%s1030_s2 + $0x10] sm:$0xff]  ;;  %v285_v11 = vld [vmem:[%s1030_s2] sm:$0xff]  ;;  %v286_v12 = vld [vmem:[%s1030_s2 + $0x8] sm:$0xff]  ;;  %p773_p1 = scmp.lt.s32.totalorder %s771_s13, %s767_s8 }
  0x16   : > { %750 = vset.pattern.permute.xlu2 %v815_v1  ;;  %s273_s21 = scalar_lea.vmem %s1028_s0, %s645_s18  ;;  %v288_v13 = vld [vmem:[%s1030_s2 + $0x18] sm:$0xff]  ;;  %v423_v15 = vld [vmem:[%s1032_s4 + $0x20] sm:$0xff]  ;;  %v692_v16 = vld [vmem:[%s1029_s1 + $0x8] sm:$0xff]  ;;  %p769_p12 = pnand %p768_p11, %p894_p5 }
  0x17   : > { %v275_v3 = vld [vmem:[%s273_s21] sm:$0xff]  ;;  %305 = vperm.xlu2 %750, %v287_v10   ;;  %v426_v14 = vld [vmem:[%s1032_s4 + $0x38] sm:$0xff]  ;;  %v425_v17 = vld [vmem:[%s1032_s4 + $0x30] sm:$0xff]  ;;  %s578_s21 = sshll.u32 %s269_s20, 4  ;;  %p774_p2 = por %p773_p1, %p772_p0  ;;  %s579_s21 = int_to_ptr.vmem [resolvable:$true] %s578_s21 }
  0x18   : > { %v276_v4 = vpack.c.bf16 %v275_v3, %v275_v3  ;;  %v421_v18 = vld [vmem:[%s1032_s4 + $0x10] sm:$0xff]  ;;  %v422_v19 = vld [vmem:[%s1032_s4 + $0x18] sm:$0xff]  ;;  %v424_v20 = vld [vmem:[%s1032_s4 + $0x28] sm:$0xff]  ;;  %p770_p13 = pneg %p769_p12 }
  0x19   : > { %v420_v21 = vld [vmem:[%s1032_s4 + $0x8] sm:$0xff]  ;;  %v542_v22 = vld [vmem:[%s1034_s6] sm:$0xf]  ;;  %v693_v23 = vld [vmem:[%s1029_s1 + $0x10] sm:$0xff] }
  0x1a   : > { %v368_v7 = vsel %vm366_vm0, %v276_v4, 0  ;;  %v419_v24 = vld [vmem:[%s1032_s4] sm:$0xff]  ;;  %v696_v62 = vld [vmem:[%s1031_s3 + $0x8] sm:$0xff]  ;;  %v697_v63 = vld [vmem:[%s1031_s3 + $0x10] sm:$0xff]  ;;  %p775_p3 = pnand %p774_p2, %p770_p13 }
  0x1b   : > { %377 = vmatpush.bf16.msra.mxu0 %v368_v7  ;;  %699 = vmatpush.bf16.msra.mxu1 %v368_v7  ;;  %v695_v61 = vld [vmem:[%s1031_s3] sm:$0xff]  ;;  %v698_v0 = vld [vmem:[%s1031_s3 + $0x18] sm:$0xff] }
  0x1d   : > { %330 = vperm.xlu0 %748, %v292_v5   ;;  %320 = vperm.xlu1 %749, %v290_v6  }
  0x1e   : > { %662 = vmatmul.msk.bf16.vlgmr.msra.gmra.mxu0 %vm353_vm1, %v691_v8  ;;  %665 = vmatmul.msk.bf16.vlgmr.msra.gmra.mxu1 %vm353_vm1, %v694_v9 }
  0x1f   : > { %310 = vperm.xlu2 %750, %v288_v13  }
  0x25   : > { %295 = vperm.xlu0 %748, %v285_v11   ;;  %300 = vperm.xlu1 %749, %v286_v12  }
  0x27   : > { %459 = vperm.xlu2 %750, %v425_v17  }
  0x2d   : > { %464 = vperm.xlu0 %748, %v426_v14   ;;  %449 = vperm.xlu1 %749, %v423_v15  }
  0x2e   : > { %663 = vmatmul.msk.bf16.gmra.mxu0 %vm353_vm1, %v692_v16 }
  0x2f   : > { %454 = vperm.xlu2 %750, %v424_v20  }
  0x35   : > { %439 = vperm.xlu0 %748, %v421_v18   ;;  %444 = vperm.xlu1 %749, %v422_v19  }
  0x37   : > { %429 = vperm.xlu2 %750, %v419_v24  }
  0x3d   : > { %434 = vperm.xlu0 %748, %v420_v21   ;;  %545 = vperm.xlu1 %749, %v542_v22  }
  0x3e   : > { %664 = vmatmul.msk.bf16.gmra.mxu0 %vm353_vm1, %v693_v23 }
  0x71   : > { %v306_v39 = vpop.permute.xlu2 %305 }
  0x79   : > { %v311_v43 = vpop.permute.xlu2 %310 }
  0x81   : > { %v460_v4 = vpop.permute.xlu2 %459 }
  0x87   : > { %v326_v25 = vpop.permute.xlu0 %325  ;;  %v316_v37 = vpop.permute.xlu1 %315 }
  0x89   : > { %v455_v11 = vpop.permute.xlu2 %454 }
  0x8f   : > { %v331_v30 = vpop.permute.xlu0 %330  ;;  %v321_v40 = vpop.permute.xlu1 %320 }
  0x97   : > { %v301_v47 = vpop.permute.xlu1 %300  ;;  %v296_v51 = vpop.permute.xlu0 %295 }
  0x9b   : > { %v379_v26 = vpop.f32.mrf.mxu0  ;;  %v394_v27 = vpop.f32.mrf.mxu1 }
  0x9c   : > { %v395_v28 = vadd.f32 %v394_v27, %v326_v25  ;;  %v380_v55 = vadd.f32 %v379_v26, %v296_v51 }
  0x9e   : > { %v405_v32 = vmax.f32 %v395_v28, 0.0  ;;  %v399_v59 = vmax.f32 %v380_v55, 0.0 }
  0x9f   : > { %v465_v3 = vpop.permute.xlu0 %464  ;;  %v450_v7 = vpop.permute.xlu1 %449 }
  0xa3   : > { %v381_v29 = vpop.f32.mrf.mxu0  ;;  %v396_v31 = vpop.f32.mrf.mxu1 }
  0xa4   : > { %v397_v33 = vadd.f32 %v396_v31, %v331_v30  ;;  %v382_v52 = vadd.f32 %v381_v29, %v301_v47  ;;  %v430_v30 = vpop.permute.xlu2 %429 }
  0xa6   : > { %v406_v34 = vmax.f32 %v397_v33, 0.0  ;;  %v400_v57 = vmax.f32 %v382_v52, 0.0 }
  0xa7   : > { %v440_v9 = vpop.permute.xlu0 %439  ;;  %v445_v19 = vpop.permute.xlu1 %444 }
  0xa8   : > { %v418_v35 = vpack.c.bf16 %v406_v34, %v405_v32  ;;  %v415_v60 = vpack.c.bf16 %v400_v57, %v399_v59 }
  0xaa   : > { %504 = vmatpush.bf16.msrb.mxu1 %v418_v35  ;;  %700 = vmatpush.bf16.msra.mxu2 %v418_v35 }
  0xab   : > { %v384_v36 = vpop.f32.mrf.mxu0  ;;  %701 = vmatpush.bf16.msra.mxu3 %v418_v35 }
  0xac   : > { %v385_v48 = vadd.f32 %v384_v36, %v306_v39 }
  0xae   : > { %v401_v56 = vmax.f32 %v385_v48, 0.0 }
  0xaf   : > { %v435_v26 = vpop.permute.xlu0 %434 }
  0xb3   : > { %v386_v38 = vpop.f32.mrf.mxu0 }
  0xb4   : > { %v387_v45 = vadd.f32 %v386_v38, %v311_v43  ;;  %v546_v38 = vpop.permute.xlu1 %545 }
  0xb6   : > { %v402_v53 = vmax.f32 %v387_v45, 0.0 }
  0xb8   : > { %v416_v58 = vpack.c.bf16 %v402_v53, %v401_v56 }
  0xbb   : > { %v389_v41 = vpop.f32.mrf.mxu0 }
  0xbc   : > { %v390_v42 = vadd.f32 %v389_v41, %v316_v37  ;;  %v537_v37 = vld [vmem:[%s1033_s5] sm:$0x3] }
  0xbe   : > { %v403_v49 = vmax.f32 %v390_v42, 0.0 }
  0xc3   : > { %v391_v44 = vpop.f32.mrf.mxu0 }
  0xc4   : > { %v392_v46 = vadd.f32 %v391_v44, %v321_v40 }
  0xc6   : > { %v404_v50 = vmax.f32 %v392_v46, 0.0 }
  0xc8   : > { %v417_v54 = vpack.c.bf16 %v404_v50, %v403_v49 }
  0xca   : > { %505 = vmatpush.bf16.msrb.mxu1 %v417_v54  ;;  %702 = vmatpush.bf16.msra.mxu2 %v417_v54 }
  0xcb   : > { %703 = vmatpush.bf16.msra.mxu3 %v417_v54 }
  0xce   : > { %506 = vmatpush.bf16.msrb.mxu1 %v416_v58  ;;  %704 = vmatpush.bf16.msra.mxu2 %v416_v58 }
  0xcf   : > { %705 = vmatpush.bf16.msra.mxu3 %v416_v58 }
  0xd2   : > { %507 = vmatpush.bf16.msrb.mxu1 %v415_v60  ;;  %706 = vmatpush.bf16.msra.mxu2 %v415_v60 }
  0xd3   : > { %707 = vmatpush.bf16.msra.mxu3 %v415_v60 }
  0xd5   : > { %682 = vmatmul.msk.bf16.vlgmr.msrb.gmra.mxu1 %vm487_vm2, %v695_v61  ;;  %683 = vmatmul.msk.bf16.vlgmr.msra.gmra.mxu2 %vm487_vm2, %v696_v62 }
  0xd6   : > { %684 = vmatmul.msk.bf16.vlgmr.msra.gmra.mxu3 %vm487_vm2, %v697_v63 }
  0xe6   : > { %685 = vmatmul.msk.bf16.gmra.mxu3 %vm487_vm2, %v698_v0 }
 0x152   : > { %v509_v8 = vpop.f32.mrf.mxu1 }
 0x153   : > { %v510_v31 = vadd.f32 %v509_v8, %v430_v30 }
 0x155   : > { %v529_v35 = vmax.f32 %v510_v31, 0.0 }
 0x158   : > { %v514_v5 = vpop.f32.mrf.mxu2 }
 0x159   : > { %v519_v1 = vpop.f32.mrf.mxu3  ;;  %v515_v24 = vadd.f32 %v514_v5, %v440_v9 }
 0x15a   : > { %v520_v16 = vadd.f32 %v519_v1, %v450_v7  ;;  %v511_v23 = vpop.f32.mrf.mxu1 }
 0x15b   : > { %v512_v27 = vadd.f32 %v511_v23, %v435_v26  ;;  %v531_v32 = vmax.f32 %v515_v24, 0.0 }
 0x15c   : > { %v533_v25 = vmax.f32 %v520_v16, 0.0 }
 0x15d   : > { %v530_v33 = vmax.f32 %v512_v27, 0.0 }
 0x15f   : > { %v538_v36 = vpack.c.bf16 %v530_v33, %v529_v35 }
 0x160   : > { %v516_v15 = vpop.f32.mrf.mxu2 }
 0x161   : > { %v521_v2 = vpop.f32.mrf.mxu3  ;;  %v517_v20 = vadd.f32 %v516_v15, %v445_v19 }
 0x162   : > { %v522_v13 = vadd.f32 %v521_v2, %v455_v11 }
 0x163   : > { %v532_v28 = vmax.f32 %v517_v20, 0.0 }
 0x164   : > { %v534_v21 = vmax.f32 %v522_v13, 0.0 }
 0x165   : > { %v539_v34 = vpack.c.bf16 %v532_v28, %v531_v32 }
 0x166   : > { %v540_v29 = vpack.c.bf16 %v534_v21, %v533_v25 }
 0x169   : > { %v524_v6 = vpop.f32.mrf.mxu3 }
 0x16a   : > { %v525_v10 = vadd.f32 %v524_v6, %v460_v4 }
 0x16c   : > { %v535_v17 = vmax.f32 %v525_v10, 0.0 }
 0x171   : > { %v526_v12 = vpop.f32.mrf.mxu3 }
 0x172   : > { %v527_v14 = vadd.f32 %v526_v12, %v465_v3 }
 0x174   : > { %v536_v18 = vmax.f32 %v527_v14, 0.0 }
 0x176   : > { %v541_v22 = vpack.c.bf16 %v536_v18, %v535_v17 }
 0x178   : > { %555 = vmatpush.bf16.msrb.mxu2 %v541_v22 }
 0x17c   : > { %556 = vmatpush.bf16.msrb.mxu2 %v540_v29 }
 0x180   : > { %557 = vmatpush.bf16.msrb.mxu2 %v539_v34 }
 0x184   : > { %558 = vmatpush.bf16.msrb.mxu2 %v538_v36 }
 0x187   : > { %686 = vmatmul.msk.bf16.vlgmr.msrb.gmra.mxu2 %vm487_vm2, %v537_v37 }
 0x20a   : > { %v560_v39 = vpop.f32.mrf.mxu2 }
 0x20b   : > { %v561_v40 = vadd.f32 %v560_v39, %v546_v38 }
 0x20d   : > { %564 = vst [vmem:[%s269_s20] sm:$0xf] %v561_v40 }
 0x20e   : > { %778 = shalt.err (!%p775_p3)
}
 0x20f   : > { %708 = dma.vmem_to_hbm [thread:$0]  (%p894_p5), %s579_s21, 64, %s581_s22, %s566_s23  }
 0x212   : > { %v562_v41 = vpop.f32.mrf.mxu2 }
 0x213 PF: > { %p714_p4 = scmp.ge.s32.totalorder %s813_s27, 2  ;;  %s592_s14 = sand.u32 1, %s801_s24  }
 0x214   : > { %s593_s17 = scalar_lea.sflag [#allocation3], %s592_s14 }
 0x215   : > { %p711_p7 = pnand %p714_p4, %p898_p6 }
 0x217   : > { %p712_p8 = pneg %p711_p7 }
 0x219   : > { %796 = dma.done.wait (%p712_p8), %s593_s17, 64  }
 0x21a   : > { %798 = vsyncadd (%p712_p8), %s593_s17, 4294967232  ;;  %p17_p9 = scmp.ge.s32.totalorder %s881_s30, 5   ;;  %s1038_s24 = smov %s805_s25 }
 0x21b   : > { %s1039_s25 = smov %s809_s26  ;;  %s1040_s26 = smov %s892_s10 }
 0x21c   : > { %s1041_s27 = smov %s881_s30  ;;  %19 = sbr.rel (!%p17_p9) target bundleno = 3 (0x3), region = 83 }
 0x221   :  { %599 = vsyncpa [#allocation3], 1 }
 0x222   :  { %601 = vsyncpa [#allocation3 + $0x1], 1 }

</bundles_post_ra>
